<compile_context>
chip_gen: v7x
topology: tpu7x:2x2x1
jax: 0.10.0
libtpu: 0.0.40
codegen_flags: <defaults>
</compile_context>

<pallas_src>
import functools

import jax
import jax.numpy as jnp
from jax import lax
from jax.experimental import pallas as pl
from jax.experimental.pallas import tpu as pltpu

XLMR_DIM = 768       # xlm-roberta-base
NUM_CLASSES = 5
C_PAD = 128          # pad class axis to one full lane width


def _round_up(a: int, b: int) -> int:
    return (a + b - 1) // b * b


def _tok_clf_loss_kernel(x_ref, w_ref, b_ref, lbl_ref, out_ref, nll_acc, cnt_acc):
    # x_ref:   (TILE_N, D)   native dtype (bf16 fast path / f32)
    # w_ref:   (D, C_PAD)    same dtype as x, lane-padded weight.T (resident)
    # b_ref:   (1, C_PAD)    f32 bias, padded classes = -1e9 (resident)
    # lbl_ref: (TILE_N, 1)   int32 labels; < 0 => ignored (and N-padding rows)
    # out_ref: (1, 8, 128)   f32 partial output block per outer-core index
    # nll_acc, cnt_acc: (1, 1) f32 VMEM scratch accumulators
    i = pl.program_id(1)

    @pl.when(i == 0)
    def _init():
        nll_acc[...] = jnp.zeros_like(nll_acc)
        cnt_acc[...] = jnp.zeros_like(cnt_acc)

    # MXU matmul in the input dtype, f32 accumulation; bias add in f32.
    logits = jnp.dot(x_ref[...], w_ref[...],
                     preferred_element_type=jnp.float32) + b_ref[...]

    # Numerically-stable log-sum-exp per row (padded classes = -1e9 -> exp == 0).
    m = jnp.max(logits, axis=-1, keepdims=True)
    lse = m + jnp.log(jnp.sum(jnp.exp(logits - m), axis=-1, keepdims=True))   # (T,1)

    # Gather the target-class logit via one-hot compare (no dynamic gather on TPU).
    labels = lbl_ref[...]                                                      # (T,1)
    col = lax.broadcasted_iota(jnp.int32, logits.shape, 1)                     # (T,C_PAD)
    picked = jnp.sum(jnp.where(col == labels, logits, 0.0),
                     axis=-1, keepdims=True)                                   # (T,1)

    valid = labels >= 0                                                        # (T,1) bool
    # Select (not multiply): ignored / padding rows contribute exactly 0 even if
    # their row produced inf/NaN.
    per_row_nll = jnp.where(valid, lse - picked, 0.0)

    nll_acc[...] += jnp.sum(per_row_nll, keepdims=True)
    cnt_acc[...] += jnp.sum(valid.astype(jnp.float32), keepdims=True)

    @pl.when(i == pl.num_programs(1) - 1)
    def _finalize():
        nll = nll_acc[...].reshape(1, 1, 1)
        cnt = cnt_acc[...].reshape(1, 1, 1)
        lane = lax.broadcasted_iota(jnp.int32, out_ref.shape, 2)
        # lane 0 = sum(nll), lane 1 = sum(valid); rest of the block zero-filled
        # so the output block is written lane-dense exactly once.
        out_ref[...] = jnp.where(lane == 0, nll, jnp.where(lane == 1, cnt, 0.0))


@functools.partial(jax.jit, static_argnames=("tile_n",))
def tokenizer_classifier_loss(wordpiece_reprs, token_type_idxs, weight, bias,
                              *, tile_n=None):
    """wordpiece_reprs: (B, S, D) in its native dtype (f32 or bf16);
    token_type_idxs: (B, S) int; weight: (5, D); bias: (5,).
    Returns scalar mean cross-entropy loss (labels < 0 ignored)."""
    B, S, D = wordpiece_reprs.shape
    N = B * S

    # reshape is free; NO dtype cast of the activation slab in the wrapper.
    x = wordpiece_reprs.reshape(N, D)
    labels = token_type_idxs.reshape(N, 1).astype(jnp.int32)

    # Tile sizing: 1024 rows (~1.5 MiB bf16 / ~3 MiB f32 per buffer) keeps the
    # double-buffered working set well inside every chip's default scoped VMEM
    # while the per-step DMA stays in the ~85%+ roofline regime.
    if tile_n is None:
        tile_n = 1024
    tile_n = _round_up(max(8, min(int(tile_n), _round_up(N, 8))), 8)

    n_tiles = pl.cdiv(N, tile_n)
    split = 2 if n_tiles >= 2 else 1          # outer "parallel" axis (v7x dual-TC)
    n_pad = _round_up(N, split * tile_n)
    if n_pad != N:
        # Padded rows get label -1 => selected out of both sums.
        x = jnp.pad(x, ((0, n_pad - N), (0, 0)))
        labels = jnp.pad(labels, ((0, n_pad - N), (0, 0)), constant_values=-1)
    tiles_per_core = n_pad // (split * tile_n)

    # Weight: transpose + lane-pad, cast to the activation dtype (tiny: D x 128).
    w_pad = jnp.zeros((D, C_PAD), x.dtype).at[:, :NUM_CLASSES].set(
        weight.T.astype(x.dtype))
    # Bias stays f32 (added post-matmul); padded classes get -1e9.
    b_pad = jnp.full((1, C_PAD), -1e9, jnp.float32).at[:, :NUM_CLASSES].set(
        bias.astype(jnp.float32))

    itemsize = jnp.dtype(x.dtype).itemsize
    cost = pl.CostEstimate(
        flops=2 * n_pad * D * C_PAD,
        transcendentals=n_pad * C_PAD,
        bytes_accessed=(n_pad * D * itemsize          # x
                        + n_pad * 4                   # labels
                        + D * C_PAD * itemsize        # weight
                        + C_PAD * 4                   # bias
                        + split * 8 * 128 * 4),       # partial outputs
    )

    partials = pl.pallas_call(
        _tok_clf_loss_kernel,
        out_shape=jax.ShapeDtypeStruct((split, 8, 128), jnp.float32),
        grid_spec=pltpu.PrefetchScalarGridSpec(
            num_scalar_prefetch=0,
            grid=(split, tiles_per_core),
            in_specs=[
                pl.BlockSpec((tile_n, D),
                             lambda c, i: (c * tiles_per_core + i, 0)),
                pl.BlockSpec((D, C_PAD), lambda c, i: (0, 0)),   # resident weight
                pl.BlockSpec((1, C_PAD), lambda c, i: (0, 0)),   # resident bias
                pl.BlockSpec((tile_n, 1),
                             lambda c, i: (c * tiles_per_core + i, 0)),
            ],
            out_specs=pl.BlockSpec((1, 8, 128), lambda c, i: (c, 0, 0)),
            scratch_shapes=[pltpu.VMEM((1, 1), jnp.float32),
                            pltpu.VMEM((1, 1), jnp.float32)],
        ),
        compiler_params=pltpu.CompilerParams(
            dimension_semantics=("parallel", "arbitrary")),
        cost_estimate=cost,
    )(x, w_pad, b_pad, labels)

    nll_sum = jnp.sum(partials[:, 0, 0])
    valid_sum = jnp.sum(partials[:, 0, 1])
    # NaN when every label is ignored, matching torch CrossEntropyLoss('mean').
    return nll_sum / valid_sum


def _reference_loss(wordpiece_reprs, token_type_idxs, weight, bias):
    # Pure-JAX reference matching torch CrossEntropyLoss(reduction='mean',
    # ignore_index<0), using the same (possibly bf16) operand values as the kernel.
    x = wordpiece_reprs.astype(jnp.float32)
    w = weight.astype(wordpiece_reprs.dtype).astype(jnp.float32)
    logits = jnp.einsum("bsd,cd->bsc", x, w,
                        precision=lax.Precision.HIGHEST) + bias.astype(jnp.float32)
    logits = logits.reshape(-1, NUM_CLASSES)
    labels = token_type_idxs.reshape(-1)
    logp = jax.nn.log_softmax(logits, axis=-1)
    valid = labels >= 0
    safe = jnp.where(valid, labels, 0)
    nll = -jnp.take_along_axis(logp, safe[:, None], axis=-1)[:, 0]
    return jnp.sum(jnp.where(valid, nll, 0.0)) / jnp.sum(valid.astype(jnp.float32))


if __name__ == "__main__":
    key = jax.random.PRNGKey(0)
    k_x, k_w, k_b, k_l, k_x2, k_l2, k_x3, k_l3 = jax.random.split(key, 8)

    D = XLMR_DIM
    # Deterministic nn.Linear-style init (uniform, bound 1/sqrt(fan_in)).
    bound = 1.0 / (D ** 0.5)
    weight = jax.random.uniform(k_w, (NUM_CLASSES, D), jnp.float32, -bound, bound)
    bias = jax.random.uniform(k_b, (NUM_CLASSES,), jnp.float32, -bound, bound)

    # Test 1: small batch, bf16 activations (native XLM-R output dtype), single tile.
    B, S = 2, 8
    wordpiece_reprs = jax.random.normal(k_x, (B, S, D), jnp.float32).astype(jnp.bfloat16)
    token_type_idxs = jax.random.randint(k_l, (B, S), 0, NUM_CLASSES, jnp.int32)
    loss = jax.block_until_ready(
        tokenizer_classifier_loss(wordpiece_reprs, token_type_idxs, weight, bias))
    ref = _reference_loss(wordpiece_reprs, token_type_idxs, weight, bias)
    assert jnp.allclose(loss, ref, atol=1e-4, rtol=1e-4), (loss, ref)

    # Test 2: multi-tile + 2-way parallel core split path, with ignored (-100) labels.
    B2, S2 = 4, 64
    x2 = jax.random.normal(k_x2, (B2, S2, D), jnp.float32).astype(jnp.bfloat16)
    l2 = jax.random.randint(k_l2, (B2, S2), 0, NUM_CLASSES, jnp.int32)
    l2 = l2.at[0, :5].set(-100)   # CrossEntropyLoss default ignore_index
    loss2 = jax.block_until_ready(
        tokenizer_classifier_loss(x2, l2, weight, bias, tile_n=64))
    ref2 = _reference_loss(x2, l2, weight, bias)
    assert jnp.allclose(loss2, ref2, atol=1e-4, rtol=1e-4), (loss2, ref2)

    # Test 3: float32 activation path, single tile, some ignored labels.
    B3, S3 = 2, 12
    x3 = jax.random.normal(k_x3, (B3, S3, D), jnp.float32)
    l3 = jax.random.randint(k_l3, (B3, S3), 0, NUM_CLASSES, jnp.int32)
    l3 = l3.at[1, :3].set(-100)
    loss3 = jax.block_until_ready(
        tokenizer_classifier_loss(x3, l3, weight, bias))
    ref3 = _reference_loss(x3, l3, weight, bias)
    assert jnp.allclose(loss3, ref3, atol=1e-5, rtol=1e-5), (loss3, ref3)

    # TODO(synk): pretrained-weight loading and the predict() path are host-side /
    # not part of forward(), so they are intentionally not implemented here.
    print("KERNEL_OK")
</pallas_src>

<mosaic_0001>
module attributes {stable_mosaic.version = 11 : i64} {
  func.func @_tok_clf_loss_kernel(%arg0: i32, %arg1: i32, %arg2: memref<16x768xbf16, #tpu.memory_space<vmem>>, %arg3: memref<768x128xbf16, #tpu.memory_space<vmem>>, %arg4: memref<1x128xf32, #tpu.memory_space<vmem>>, %arg5: memref<16x1xi32, #tpu.memory_space<vmem>>, %arg6: memref<1x8x128xf32, #tpu.memory_space<vmem>>, %arg7: memref<1x1xf32, #tpu.memory_space<vmem>>, %arg8: memref<1x1xf32, #tpu.memory_space<vmem>>) attributes {dimension_semantics = [#tpu.dimension_semantics<parallel>, #tpu.dimension_semantics<arbitrary>], iteration_bounds = array<i64: 1, 1>, scalar_prefetch = 0 : i64, scratch_operands = 2 : i64, tpu.core_type = #tpu.core_type<tc>, window_params = [{transform_indices = @transform_0, window_bounds = array<i64: 16, 768>}, {pipeline_mode = #tpu.pipeline_mode<synchronous>, transform_indices = @transform_1, window_bounds = array<i64: 768, 128>}, {pipeline_mode = #tpu.pipeline_mode<synchronous>, transform_indices = @transform_2, window_bounds = array<i64: 1, 128>}, {transform_indices = @transform_3, window_bounds = array<i64: 16, 1>}, {transform_indices = @transform_4, window_bounds = array<i64: 1, 8, 128>}]} {
    %c0_i32 = arith.constant 0 : i32
    %0 = arith.cmpi eq, %arg1, %c0_i32 : i32
    %1 = arith.extui %0 : i1 to i32
    %c0_i32_0 = arith.constant 0 : i32
    %2 = arith.cmpi ne, %1, %c0_i32_0 : i32
    scf.if %2 {
      %cst_26 = arith.constant 0.000000e+00 : f32
      %52 = vector.broadcast %cst_26 : f32 to vector<1x1xf32>
      %c0_27 = arith.constant 0 : index
      %c0_28 = arith.constant 0 : index
      %53 = vector.load %arg7[%c0_27, %c0_28] : memref<1x1xf32, #tpu.memory_space<vmem>>, vector<1x1xf32>
      tpu.vector_store %arg7[%c0_27, %c0_28], %52 {strides = array<i32>} : memref<1x1xf32, #tpu.memory_space<vmem>>, vector<1x1xf32>,
      %cst_29 = arith.constant 0.000000e+00 : f32
      %54 = vector.broadcast %cst_29 : f32 to vector<1x1xf32>
      %c0_30 = arith.constant 0 : index
      %c0_31 = arith.constant 0 : index
      %55 = vector.load %arg8[%c0_30, %c0_31] : memref<1x1xf32, #tpu.memory_space<vmem>>, vector<1x1xf32>
      tpu.vector_store %arg8[%c0_30, %c0_31], %54 {strides = array<i32>} : memref<1x1xf32, #tpu.memory_space<vmem>>, vector<1x1xf32>,
    } else {
    }
    %c0 = arith.constant 0 : index
    %c0_1 = arith.constant 0 : index
    %3 = vector.load %arg2[%c0, %c0_1] : memref<16x768xbf16, #tpu.memory_space<vmem>>, vector<16x768xbf16>
    %c0_2 = arith.constant 0 : index
    %c0_3 = arith.constant 0 : index
    %4 = vector.load %arg3[%c0_2, %c0_3] : memref<768x128xbf16, #tpu.memory_space<vmem>>, vector<768x128xbf16>
    %cst = arith.constant dense<0.000000e+00> : vector<16x128xf32>
    %5 = tpu.matmul %3, %4, %cst {dimension_numbers = #tpu.dot_dimension_numbers<[1], [0], [0], [1], [0, 0, 1, 1], [], []>} : vector<16x768xbf16>, vector<768x128xbf16>, vector<16x128xf32> -> vector<16x128xf32>
    %c0_4 = arith.constant 0 : index
    %c0_5 = arith.constant 0 : index
    %6 = vector.load %arg4[%c0_4, %c0_5] : memref<1x128xf32, #tpu.memory_space<vmem>>, vector<1x128xf32>
    %7 = vector.broadcast %6 : vector<1x128xf32> to vector<16x128xf32>
    %8 = arith.addf %5, %7 : vector<16x128xf32>
    %cst_6 = arith.constant dense<0xFF800000> : vector<16xf32>
    %9 = vector.multi_reduction <maximumf>, %8, %cst_6 [1] : vector<16x128xf32> to vector<16xf32>
    %10 = vector.shape_cast %9 : vector<16xf32> to vector<16x1xf32>
    %11 = vector.broadcast %10 : vector<16x1xf32> to vector<16x128xf32>
    %12 = arith.subf %8, %11 : vector<16x128xf32>
    %13 = math.exp %12 : vector<16x128xf32>
    %cst_7 = arith.constant dense<0.000000e+00> : vector<16xf32>
    %14 = vector.multi_reduction <add>, %13, %cst_7 [1] : vector<16x128xf32> to vector<16xf32>
    %15 = vector.shape_cast %14 : vector<16xf32> to vector<16x1xf32>
    %16 = math.log %15 : vector<16x1xf32>
    %17 = arith.addf %10, %16 : vector<16x1xf32>
    %c0_8 = arith.constant 0 : index
    %c0_9 = arith.constant 0 : index
    %18 = vector.load %arg5[%c0_8, %c0_9] : memref<16x1xi32, #tpu.memory_space<vmem>>, vector<16x1xi32>
    %19 = tpu.iota {dimensions = array<i32: 1>} : vector<16x128xi32>
    %20 = vector.broadcast %18 : vector<16x1xi32> to vector<16x128xi32>
    %21 = arith.cmpi eq, %19, %20 : vector<16x128xi32>
    %cst_10 = arith.constant 0.000000e+00 : f32
    %22 = vector.broadcast %cst_10 : f32 to vector<16x128xf32>
    %23 = arith.select %21, %8, %22 : vector<16x128xi1>, vector<16x128xf32>
    %cst_11 = arith.constant dense<0.000000e+00> : vector<16xf32>
    %24 = vector.multi_reduction <add>, %23, %cst_11 [1] : vector<16x128xf32> to vector<16xf32>
    %25 = vector.shape_cast %24 : vector<16xf32> to vector<16x1xf32>
    %c0_i32_12 = arith.constant 0 : i32
    %26 = vector.broadcast %c0_i32_12 : i32 to vector<16x1xi32>
    %27 = arith.cmpi sge, %18, %26 : vector<16x1xi32>
    %28 = arith.subf %17, %25 : vector<16x1xf32>
    %cst_13 = arith.constant 0.000000e+00 : f32
    %29 = vector.broadcast %cst_13 : f32 to vector<16x1xf32>
    %30 = arith.select %27, %28, %29 : vector<16x1xi1>, vector<16x1xf32>
    %c0_14 = arith.constant 0 : index
    %c0_15 = arith.constant 0 : index
    %31 = vector.load %arg7[%c0_14, %c0_15] : memref<1x1xf32, #tpu.memory_space<vmem>>, vector<1x1xf32>
    %32 = vector.shape_cast %30 : vector<16x1xf32> to vector<1x16x1xf32>
    %cst_16 = arith.constant dense<0.000000e+00> : vector<1xf32>
    %33 = vector.multi_reduction <add>, %32, %cst_16 [1, 2] : vector<1x16x1xf32> to vector<1xf32>
    %34 = vector.shape_cast %33 : vector<1xf32> to vector<1x1x1xf32>
    %35 = vector.extract %34[0, 0, 0] : f32 from vector<1x1x1xf32>
    %36 = vector.broadcast %35 : f32 to vector<1x1xf32>
    %37 = arith.addf %31, %36 : vector<1x1xf32>
    %c0_17 = arith.constant 0 : index
    %c0_18 = arith.constant 0 : index
    %38 = vector.load %arg7[%c0_17, %c0_18] : memref<1x1xf32, #tpu.memory_space<vmem>>, vector<1x1xf32>
    tpu.vector_store %arg7[%c0_17, %c0_18], %37 {strides = array<i32>} : memref<1x1xf32, #tpu.memory_space<vmem>>, vector<1x1xf32>,
    %c0_19 = arith.constant 0 : index
    %c0_20 = arith.constant 0 : index
    %39 = vector.load %arg8[%c0_19, %c0_20] : memref<1x1xf32, #tpu.memory_space<vmem>>, vector<1x1xf32>
    %40 = arith.extui %27 : vector<16x1xi1> to vector<16x1xi32>
    %41 = arith.sitofp %40 : vector<16x1xi32> to vector<16x1xf32>
    %42 = vector.shape_cast %41 : vector<16x1xf32> to vector<1x16x1xf32>
    %cst_21 = arith.constant dense<0.000000e+00> : vector<1xf32>
    %43 = vector.multi_reduction <add>, %42, %cst_21 [1, 2] : vector<1x16x1xf32> to vector<1xf32>
    %44 = vector.shape_cast %43 : vector<1xf32> to vector<1x1x1xf32>
    %45 = vector.extract %44[0, 0, 0] : f32 from vector<1x1x1xf32>
    %46 = vector.broadcast %45 : f32 to vector<1x1xf32>
    %47 = arith.addf %39, %46 : vector<1x1xf32>
    %c0_22 = arith.constant 0 : index
    %c0_23 = arith.constant 0 : index
    %48 = vector.load %arg8[%c0_22, %c0_23] : memref<1x1xf32, #tpu.memory_space<vmem>>, vector<1x1xf32>
    tpu.vector_store %arg8[%c0_22, %c0_23], %47 {strides = array<i32>} : memref<1x1xf32, #tpu.memory_space<vmem>>, vector<1x1xf32>,
    %c0_i32_24 = arith.constant 0 : i32
    %49 = arith.cmpi eq, %arg1, %c0_i32_24 : i32
    %50 = arith.extui %49 : i1 to i32
    %c0_i32_25 = arith.constant 0 : i32
    %51 = arith.cmpi ne, %50, %c0_i32_25 : i32
    scf.if %51 {
      %c0_26 = arith.constant 0 : index
      %c0_27 = arith.constant 0 : index
      %52 = vector.load %arg7[%c0_26, %c0_27] : memref<1x1xf32, #tpu.memory_space<vmem>>, vector<1x1xf32>
      %53 = vector.shape_cast %52 : vector<1x1xf32> to vector<1x1x1xf32>
      %c0_28 = arith.constant 0 : index
      %c0_29 = arith.constant 0 : index
      %54 = vector.load %arg8[%c0_28, %c0_29] : memref<1x1xf32, #tpu.memory_space<vmem>>, vector<1x1xf32>
      %55 = vector.shape_cast %54 : vector<1x1xf32> to vector<1x1x1xf32>
      %56 = tpu.iota {dimensions = array<i32: 2>} : vector<1x8x128xi32>
      %c0_i32_30 = arith.constant 0 : i32
      %57 = vector.broadcast %c0_i32_30 : i32 to vector<1x8x128xi32>
      %58 = arith.cmpi eq, %56, %57 : vector<1x8x128xi32>
      %c1_i32 = arith.constant 1 : i32
      %59 = vector.broadcast %c1_i32 : i32 to vector<1x8x128xi32>
      %60 = arith.cmpi eq, %56, %59 : vector<1x8x128xi32>
      %cst_31 = arith.constant 0.000000e+00 : f32
      %61 = vector.shape_cast %55 : vector<1x1x1xf32> to vector<1x1x1xf32>
      %62 = vector.broadcast %61 : vector<1x1x1xf32> to vector<1x8x128xf32>
      %63 = vector.broadcast %cst_31 : f32 to vector<1x8x128xf32>
      %64 = arith.select %60, %62, %63 : vector<1x8x128xi1>, vector<1x8x128xf32>
      %65 = vector.shape_cast %53 : vector<1x1x1xf32> to vector<1x1x1xf32>
      %66 = vector.broadcast %65 : vector<1x1x1xf32> to vector<1x8x128xf32>
      %67 = arith.select %58, %66, %64 : vector<1x8x128xi1>, vector<1x8x128xf32>
      %c0_32 = arith.constant 0 : index
      %c0_33 = arith.constant 0 : index
      %c0_34 = arith.constant 0 : index
      %68 = vector.load %arg6[%c0_32, %c0_33, %c0_34] : memref<1x8x128xf32, #tpu.memory_space<vmem>>, vector<1x8x128xf32>
      tpu.vector_store %arg6[%c0_32, %c0_33, %c0_34], %67 {strides = array<i32>} : memref<1x8x128xf32, #tpu.memory_space<vmem>>, vector<1x8x128xf32>,
    } else {
    }
    return
  }
  func.func @transform_0(%arg0: i32, %arg1: i32) -> (i32, i32) {
    %c1_i32 = arith.constant 1 : i32
    %0 = arith.muli %arg0, %c1_i32 : i32
    %1 = arith.addi %0, %arg1 : i32
    %c0_i32 = arith.constant 0 : i32
    %c0_i32_0 = arith.constant 0 : i32
    return %1, %c0_i32 : i32, i32
  }
  func.func @transform_1(%arg0: i32, %arg1: i32) -> (i32, i32) {
    %c0_i32 = arith.constant 0 : i32
    %c0_i32_0 = arith.constant 0 : i32
    %c0_i32_1 = arith.constant 0 : i32
    return %c0_i32, %c0_i32_0 : i32, i32
  }
  func.func @transform_2(%arg0: i32, %arg1: i32) -> (i32, i32) {
    %c0_i32 = arith.constant 0 : i32
    %c0_i32_0 = arith.constant 0 : i32
    %c0_i32_1 = arith.constant 0 : i32
    return %c0_i32, %c0_i32_0 : i32, i32
  }
  func.func @transform_3(%arg0: i32, %arg1: i32) -> (i32, i32) {
    %c1_i32 = arith.constant 1 : i32
    %0 = arith.muli %arg0, %c1_i32 : i32
    %1 = arith.addi %0, %arg1 : i32
    %c0_i32 = arith.constant 0 : i32
    %c0_i32_0 = arith.constant 0 : i32
    return %1, %c0_i32 : i32, i32
  }
  func.func @transform_4(%arg0: i32, %arg1: i32) -> (i32, i32, i32) {
    %c0_i32 = arith.constant 0 : i32
    %c0_i32_0 = arith.constant 0 : i32
    %c0_i32_1 = arith.constant 0 : i32
    return %arg0, %c0_i32, %c0_i32_0 : i32, i32, i32
  }
}

</mosaic_0001>

<bundles_post_ra>
// kernel: tokenizer_classifier_loss.1
= control target key start
LH: loop header
LB: loop body
LE: loop exit
PB: predicated region body
PF: predicated region fallthrough
CT: control target
= control target key end

     0   :  { %v946_v1 = vmov 0   ;;  %vm667_vm4 = vcmask 7168   ;;  %vm69_vm5 = vcmask 0   ;;  %s1177_s1 = inlined_call_operand.vmem [shape: bf16[768,128], index: 1, kind: input, shape index: {}]   ;;  %s1178_s0 = inlined_call_operand.vmem [shape: bf16[16,768], index: 0, kind: input, shape index: {}]   ;;  %s1179_s3 = inlined_call_operand.vmem [shape: s32[16,1], index: 3, kind: input, shape index: {}]   ;;  %s1180_s2 = inlined_call_operand.vmem [shape: f32[1,128], index: 2, kind: input, shape index: {}]   ;;  %s1181_s4 = inlined_call_operand.vmem [shape: f32[1,8,128], index: 4, kind: output, shape index: {}]  }
   0x1   :  { %v881_v0 = vld [vmem:[%s1177_s1 + $0x40] sm:$0xff]   ;;  %879 = vset.pattern.permute.xlu1 %v946_v1  ;;  %880 = vset.pattern.permute.xlu0 %v946_v1  ;;  %v885_v5 = vld [vmem:[%s1177_s1 + $0x48] sm:$0xff]   ;;  %v889_v9 = vld [vmem:[%s1177_s1 + $0x50] sm:$0xff]  }
   0x2   :  { %v882_v2 = vld [vmem:[%s1177_s1] sm:$0xff]   ;;  %807 = vmatprep.subr.bf16.mxu0 %v881_v0  ;;  %v886_v6 = vld [vmem:[%s1177_s1 + $0x8] sm:$0xff]   ;;  %v890_v10 = vld [vmem:[%s1177_s1 + $0x10] sm:$0xff]  }
   0x3   :  { %v883_v3 = vld [vmem:[%s1177_s1 + $0xc0] sm:$0xff]   ;;  %808 = vmatpush3.bf16.msra.mxu0 %v882_v2  ;;  %v887_v7 = vld [vmem:[%s1177_s1 + $0xc8] sm:$0xff]   ;;  %v891_v11 = vld [vmem:[%s1177_s1 + $0xd0] sm:$0xff]  }
   0x4   :  { %v884_v4 = vld [vmem:[%s1177_s1 + $0x80] sm:$0xff]   ;;  %829 = vmatprep.subr.bf16.mxu1 %v883_v3  ;;  %809 = vmatprep.subr.bf16.mxu0 %v885_v5  ;;  %v888_v8 = vld [vmem:[%s1177_s1 + $0x88] sm:$0xff]   ;;  %v892_v12 = vld [vmem:[%s1177_s1 + $0x90] sm:$0xff]  }
   0x5   :  { %830 = vmatpush3.bf16.msra.mxu1 %v884_v4  ;;  %v893_v13 = vld [vmem:[%s1177_s1 + $0x58] sm:$0xff]   ;;  %v897_v17 = vld [vmem:[%s1177_s1 + $0x60] sm:$0xff]   ;;  %v901_v21 = vld [vmem:[%s1177_s1 + $0x68] sm:$0xff]  }
   0x6   :  { %831 = vmatprep.subr.bf16.mxu1 %v887_v7  ;;  %v894_v14 = vld [vmem:[%s1177_s1 + $0x18] sm:$0xff]   ;;  %v898_v18 = vld [vmem:[%s1177_s1 + $0x20] sm:$0xff]   ;;  %v902_v22 = vld [vmem:[%s1177_s1 + $0x28] sm:$0xff]  }
   0x7   :  { %810 = vmatpush3.bf16.msra.mxu0 %v886_v6  ;;  %v895_v15 = vld [vmem:[%s1177_s1 + $0xd8] sm:$0xff]   ;;  %v899_v19 = vld [vmem:[%s1177_s1 + $0xe0] sm:$0xff]   ;;  %v903_v23 = vld [vmem:[%s1177_s1 + $0xe8] sm:$0xff]  }
   0x8   :  { %811 = vmatprep.subr.bf16.mxu0 %v889_v9  ;;  %v896_v16 = vld [vmem:[%s1177_s1 + $0x98] sm:$0xff]   ;;  %v900_v20 = vld [vmem:[%s1177_s1 + $0xa0] sm:$0xff]   ;;  %v904_v24 = vld [vmem:[%s1177_s1 + $0xa8] sm:$0xff]  }
   0x9   :  { %832 = vmatpush3.bf16.msra.mxu1 %v888_v8  ;;  %v905_v25 = vld [vmem:[%s1177_s1 + $0x70] sm:$0xff]   ;;  %v909_v29 = vld [vmem:[%s1177_s1 + $0x78] sm:$0xff]   ;;  %v916_v35 = vld [vmem:[%s1177_s1 + $0x140] sm:$0xff]  }
   0xa   :  { %833 = vmatprep.subr.bf16.mxu1 %v891_v11  ;;  %v906_v26 = vld [vmem:[%s1177_s1 + $0x30] sm:$0xff]   ;;  %v910_v30 = vld [vmem:[%s1177_s1 + $0x38] sm:$0xff]   ;;  %v917_v36 = vld [vmem:[%s1178_s0 + $0x8] ss:$24 sps:$4 sm:$0xff]  }
   0xb   :  { %812 = vmatpush3.bf16.msra.mxu0 %v890_v10  ;;  %v907_v27 = vld [vmem:[%s1177_s1 + $0xf0] sm:$0xff]   ;;  %v911_v31 = vld [vmem:[%s1177_s1 + $0xf8] sm:$0xff]   ;;  %v919_v37 = vld [vmem:[%s1178_s0 + $0xc] ss:$24 sps:$4 sm:$0xff]  }
   0xc   :  { %813 = vmatprep.subr.bf16.mxu0 %v893_v13  ;;  %v908_v28 = vld [vmem:[%s1177_s1 + $0xb0] sm:$0xff]   ;;  %v912_v32 = vld [vmem:[%s1178_s0] ss:$24 sps:$4 sm:$0xff]   ;;  %v914_v33 = vld [vmem:[%s1178_s0 + $0x4] ss:$24 sps:$4 sm:$0xff]   ;;  %572 = vmatprep.mubr.bf16.mxu1 %v919_v37 }
   0xd   :  { %834 = vmatpush3.bf16.msra.mxu1 %v892_v12  ;;  %v915_v34 = vld [vmem:[%s1177_s1 + $0xb8] sm:$0xff]   ;;  %531 = vmatprep.mubr.bf16.mxu0 %v914_v33  ;;  %v920_v38 = vld [vmem:[%s1177_s1 + $0x100] sm:$0xff]   ;;  %v921_v39 = vld [vmem:[%s1177_s1 + $0x148] sm:$0xff]  }
   0xe   :  { %835 = vmatprep.subr.bf16.mxu1 %v895_v15  ;;  %v922_v40 = vld [vmem:[%s1177_s1 + $0x108] sm:$0xff]   ;;  %v923_v41 = vld [vmem:[%s1177_s1 + $0x150] sm:$0xff]   ;;  %v925_v43 = vld [vmem:[%s1177_s1 + $0x158] sm:$0xff]  }
   0xf   :  { %814 = vmatpush3.bf16.msra.mxu0 %v894_v14  ;;  %v924_v42 = vld [vmem:[%s1177_s1 + $0x110] sm:$0xff]   ;;  %v926_v44 = vld [vmem:[%s1177_s1 + $0x118] sm:$0xff]   ;;  %v927_v45 = vld [vmem:[%s1177_s1 + $0x160] sm:$0xff]  }
  0x10   :  { %815 = vmatprep.subr.bf16.mxu0 %v897_v17  ;;  %v928_v46 = vld [vmem:[%s1177_s1 + $0x120] sm:$0xff]   ;;  %v929_v47 = vld [vmem:[%s1177_s1 + $0x168] sm:$0xff]   ;;  %v931_v52 = vld [vmem:[%s1177_s1 + $0x170] sm:$0xff]  }
  0x11   :  { %836 = vmatpush3.bf16.msra.mxu1 %v896_v16  ;;  %v937_v48 = vld [vmem:[%s1178_s0 + $0x14] ss:$24 sps:$4 sm:$0xff]   ;;  %v1120_v49 = vld [vmem:[%s1179_s3] sm:$0xff]  ;;  %v933_v54 = vld [vmem:[%s1177_s1 + $0x178] sm:$0xff]  }
  0x12   :  { %837 = vmatprep.subr.bf16.mxu1 %v899_v19  ;;  %647 = vperm.xlu1 %879, %v1120_v49   ;;  %v930_v50 = vld [vmem:[%s1177_s1 + $0x128] sm:$0xff]   ;;  %v932_v53 = vld [vmem:[%s1177_s1 + $0x130] sm:$0xff]   ;;  %v934_v55 = vld [vmem:[%s1177_s1 + $0x138] sm:$0xff]   ;;  %vm660_vm2 = vcmp.ge.s32.totalorder %v1120_v49, 0 }
  0x13   :  { %816 = vmatpush3.bf16.msra.mxu0 %v898_v18  ;;  %v1129_v51 = vld [vmem:[%s1179_s3 + $0x8] sm:$0xff]  ;;  %v748_v58 = vld [vmem:[%s1180_s2] ss:$0 sm:$0xff] }
  0x14   :  { %817 = vmatprep.subr.bf16.mxu0 %v901_v21  ;;  %v935_v56 = vld [vmem:[%s1178_s0 + $0x10] ss:$24 sps:$4 sm:$0xff]   ;;  %vm661_vm3 = vcmp.ge.s32.totalorder %v1129_v51, 0 }
  0x15   :  { %838 = vmatpush3.bf16.msra.mxu1 %v900_v20 }
  0x16   :  { %839 = vmatprep.subr.bf16.mxu1 %v903_v23  ;;  %650 = vperm.xlu1 %879, %v1129_v51  }
  0x17   :  { %818 = vmatpush3.bf16.msra.mxu0 %v902_v22 }
  0x18   :  { %819 = vmatprep.subr.bf16.mxu0 %v905_v25 }
  0x19   :  { %840 = vmatpush3.bf16.msra.mxu1 %v904_v24  ;;  %v644_v24 = vlaneseq }
  0x1a   :  { %841 = vmatprep.subr.bf16.mxu1 %v907_v27 }
  0x1b   :  { %820 = vmatpush3.bf16.msra.mxu0 %v906_v26  ;;  %v1150_v26 = vand.u32 127, %v644_v24 }
  0x1c   :  { %821 = vmatprep.subr.bf16.mxu0 %v909_v29 }
  0x1d   :  { %842 = vmatpush3.bf16.msra.mxu1 %v908_v28  ;;  %vm710_vm6 = vcmp.eq.s32.totalorder %v1150_v26, 1  ;;  %vm709_vm7 = vcmp.eq.s32.totalorder %v1150_v26, 0 }
  0x1e   :  { %843 = vmatprep.subr.bf16.mxu1 %v911_v31 }
  0x1f   :  { %822 = vmatpush3.bf16.msra.mxu0 %v910_v30 }
  0x20   :  { %851 = vmatprep.subr.bf16.mxu0 %v916_v35 }
  0x21   :  { %844 = vmatpush3.bf16.msra.mxu1 %v915_v34 }
  0x22   :  { %532 = vmatmul.mubr.bf16.vlgmr.msra.gmra.mrb[0].mxu0 %v912_v32  ;;  %v947_v32 = vmov 0.0  }
  0x23   :  { %852 = vmatpush3.bf16.msra.mxu0 %v920_v38  ;;  %613 = vmatprep.mubr.bf16.mxu0 %v937_v48  ;;  %v803_v33 = vsel %vm660_vm2, 1.0, %v947_v32  ;;  %v804_v34 = vsel %vm661_vm3, 1.0, %v947_v32  ;;  %70 = vst.msk [vmem:[#allocation2] sm:$0x1] %vm69_vm5, %v947_v32  ;;  %71 = vst.msk [vmem:[#allocation3] sm:$0x1] %vm69_vm5, %v947_v32 }
  0x24   :  { %573 = vmatmul.mubr.bf16.vlgmr.msra.gmra.mrb[0].mxu1 %v917_v36  ;;  %853 = vmatprep.subr.bf16.mxu0 %v921_v39  ;;  %v689_v35 = vsel %vm667_vm4, %v803_v33, 0.0  ;;  %v690_v36 = vsel %vm667_vm4, %v804_v34, 0.0 }
  0x25   :  { %v691_v37 = vadd.f32 %v690_v36, %v689_v35 }
  0x27   :  { %854 = vmatpush3.bf16.msra.mxu0 %v922_v40 }
  0x28   :  { %855 = vmatprep.subr.bf16.mxu0 %v923_v41 }
  0x2b   :  { %856 = vmatpush3.bf16.msra.mxu0 %v924_v42 }
  0x2c   :  { %857 = vmatprep.subr.bf16.mxu0 %v925_v43 }
  0x2f   :  { %858 = vmatpush3.bf16.msra.mxu0 %v926_v44 }
  0x30   :  { %859 = vmatprep.subr.bf16.mxu0 %v927_v45 }
  0x33   :  { %860 = vmatpush3.bf16.msra.mxu0 %v928_v46 }
  0x34   :  { %861 = vmatprep.subr.bf16.mxu0 %v929_v47 }
  0x37   :  { %862 = vmatpush3.bf16.msra.mxu0 %v930_v50 }
  0x38   :  { %863 = vmatprep.subr.bf16.mxu0 %v931_v52 }
  0x3b   :  { %864 = vmatpush3.bf16.msra.mxu0 %v932_v53 }
  0x3c   :  { %865 = vmatprep.subr.bf16.mxu0 %v933_v54 }
  0x3f   :  { %866 = vmatpush3.bf16.msra.mxu0 %v934_v55 }
  0x42   :  { %614 = vmatmul.mubr.bf16.vlgmr.msra.gmra.mrb[4].mxu0 %v935_v56 }
  0x91   :  { %v648_v25 = vpop.permute.xlu1 %647 }
  0x92   :  { %vm652_vm0 = vcmp.eq.s32.totalorder %v1150_v26, %v648_v25 }
  0x95   :  { %v651_v28 = vpop.permute.xlu1 %650 }
  0x96   :  { %vm653_vm1 = vcmp.eq.s32.totalorder %v1150_v26, %v651_v28 }
  0xf5   :  { %v823_v57 = vpop.f32.mrb[0].mxu0 }
  0xf6   :  { %v824_v59 = vpop.f32.mrb[1].mxu0 }
  0xf7   :  { %v825_v60 = vadd.f32 %v824_v59, %v823_v57  ;;  %v826_v61 = vpop.f32.mrb[2].mxu0  ;;  %v845_v62 = vpop.f32.mrb[0].mxu1 }
  0xf8   :  { %v827_v63 = vpop.f32.mrb[3].mxu0  ;;  %v846_v2 = vpop.f32.mrb[1].mxu1 }
  0xf9   :  { %v534_v0 = vadd.f32 %v825_v60, %v748_v58  ;;  %v828_v1 = vadd.f32 %v827_v63, %v826_v61  ;;  %v847_v3 = vadd.f32 %v846_v2, %v845_v62  ;;  %v848_v4 = vpop.f32.mrb[2].mxu1 }
  0xfa   :  { %v849_v6 = vpop.f32.mrb[3].mxu1 }
  0xfb   :  { %v537_v5 = vadd.f32 %v828_v1, %v748_v58  ;;  %v575_v7 = vadd.f32 %v847_v3, %v534_v0  ;;  %v850_v8 = vadd.f32 %v849_v6, %v848_v4 }
  0xfd   :  { %v578_v9 = vadd.f32 %v850_v8, %v537_v5  ;;  %v666_v5 = vld [vmem:[#allocation2] sm:$0x1]  ;;  %v684_v8 = vld [vmem:[#allocation3] sm:$0x1] }
 0x115   :  { %v867_v10 = vpop.f32.mrb[4].mxu0 }
 0x116   :  { %v868_v11 = vpop.f32.mrb[5].mxu0 }
 0x117   :  { %v869_v12 = vadd.f32 %v868_v11, %v867_v10  ;;  %v870_v13 = vpop.f32.mrb[6].mxu0 }
 0x118   :  { %v871_v14 = vpop.f32.mrb[7].mxu0 }
 0x119   :  { %v616_v15 = vadd.f32 %v869_v12, %v575_v7  ;;  %v872_v16 = vadd.f32 %v871_v14, %v870_v13 }
 0x11b   :  { %v619_v17 = vadd.f32 %v872_v16, %v578_v9  ;;  %622 = vmax.xlane.f32.xlu0 %v616_v15  ;;  %v654_v30 = vsel %vm652_vm0, %v616_v15, 0.0 }
 0x11d   :  { %v655_v31 = vsel %vm653_vm1, %v619_v17, 0.0 }
 0x11f   :  { %624 = vmax.xlane.f32.xlu0 %v619_v17 }
 0x1a8   :  { %v623_v18 = vpop.xlane.xlu0 %622 }
 0x1a9   :  { %v626_v19 = vsub.f32 %v616_v15, %v623_v18 }
 0x1ab   :  { %v628_v20 = vmul.f32 1.442695, %v626_v19 }
 0x1ac   :  { %v625_v21 = vpop.xlane.xlu0 %624 }
 0x1ad   :  { %938 = vpow2.f32 %v628_v20  ;;  %v627_v22 = vsub.f32 %v619_v17, %v625_v21 }
 0x1af   :  { %v630_v23 = vmul.f32 1.442695, %v627_v22 }
 0x1b1   :  { %940 = vpow2.f32 %v630_v23 }
 0x1b7   :  { %v939_v27 = vpop.eup %938 }
 0x1b8   :  { %632 = vadd.xlane.f32.xlu0 %v939_v27 }
 0x1bb   :  { %v941_v29 = vpop.eup %940 }
 0x1bc   :  { %634 = vadd.xlane.f32.xlu1 %v941_v29  ;;  %656 = vadd.xlane.f32.xlu0 %v654_v30 }
 0x1c0   :  { %658 = vadd.xlane.f32.xlu0 %v655_v31 }
 0x245   :  { %v633_v38 = vpop.xlane.xlu0 %632 }
 0x246   :  { %942 = vlog2.f32 %v633_v38 }
 0x249   :  { %v635_v39 = vpop.xlane.xlu1 %634  ;;  %v657_v42 = vpop.xlane.xlu0 %656 }
 0x24a   :  { %944 = vlog2.f32 %v635_v39 }
 0x24d   :  { %v659_v48 = vpop.xlane.xlu0 %658 }
 0x250   :  { %v943_v40 = vpop.eup %942 }
 0x251   :  { %v637_v41 = vmul.f32 0.6931472, %v943_v40 }
 0x253   :  { %v640_v43 = vadd.f32 %v637_v41, %v623_v18 }
 0x254   :  { %v945_v44 = vpop.eup %944 }
 0x255   :  { %v639_v45 = vmul.f32 0.6931472, %v945_v44  ;;  %v662_v46 = vsub.f32 %v640_v43, %v657_v42 }
 0x257   :  { %v641_v47 = vadd.f32 %v639_v45, %v625_v21  ;;  %v664_v50 = vsel %vm660_vm2, %v662_v46, 0.0 }
 0x258   :  { %v668_v54 = vsel %vm667_vm4, %v664_v50, 0.0 }
 0x259   :  { %v663_v52 = vsub.f32 %v641_v47, %v659_v48 }
 0x25b   :  { %v665_v53 = vsel %vm661_vm3, %v663_v52, 0.0 }
 0x25c   :  { %v669_v55 = vsel %vm667_vm4, %v665_v53, 0.0 }
 0x25d   :  { %v670_v56 = vadd.f32 %v669_v55, %v668_v54 }
 0x25f   :  { %671 = vadd.xlane.f32.xlu0 %v670_v56 }
 0x263   :  { %692 = vadd.xlane.f32.xlu0 %v691_v37 }
 0x2ec   :  { %v672_v57 = vpop.xlane.xlu0 %671 }
 0x2ed   :  { %v673_v58 = vrot.slane %v672_v57, 4 }
 0x2ef   :  { %v674_v49 = vadd.f32 %v673_v58, %v672_v57 }
 0x2f0   :  { %v693_v59 = vpop.xlane.xlu0 %692 }
 0x2f1   :  { %v675_v60 = vrot.slane %v674_v49, 2  ;;  %v694_v61 = vrot.slane %v693_v59, 4 }
 0x2f3   :  { %v695_v51 = vadd.f32 %v694_v61, %v693_v59  ;;  %v676_v62 = vadd.f32 %v675_v60, %v674_v49 }
 0x2f5   :  { %v696_v63 = vrot.slane %v695_v51, 2  ;;  %v677_v0 = vrot.slane %v676_v62, 1 }
 0x2f7   :  { %v678_v1 = vadd.f32 %v677_v0, %v676_v62  ;;  %v697_v2 = vadd.f32 %v696_v63, %v695_v51 }
 0x2f9   :  { %873 = vpush %v678_v1  ;;  %v698_v3 = vrot.slane %v697_v2, 1 }
 0x2fb   :  { %v699_v4 = vadd.f32 %v698_v3, %v697_v2 }
 0x2fd   :  { %875 = vpush %v699_v4 }
 0x32a   :  { %s874_s0 = spop %873 }
 0x32b   :  { %v680_v6 = vstv %s874_s0 }
 0x32c   :  { %v681_v7 = vadd.f32 %v680_v6, %v666_v5 }
 0x32e   :  { %683 = vst.msk [vmem:[#allocation2] sm:$0x1] %vm69_vm5, %v681_v7  ;;  %s876_s1 = spop %875 }
 0x32f   :  { %v701_v9 = vstv %s876_s1 }
 0x330   :  { %v702_v10 = vadd.f32 %v701_v9, %v684_v8 }
 0x332   :  { %703 = vst.msk [vmem:[#allocation3] sm:$0x1] %vm69_vm5, %v702_v10 }
 0x335   :  { %v806_v11 = vld [vmem:[#allocation2] ss:$0 sm:$0xff] }
 0x336   :  { %727 = vperm.xlu1 %879, %v806_v11  }
 0x339   :  { %v805_v12 = vld [vmem:[#allocation3] ss:$0 sm:$0xff] }
 0x33a   :  { %717 = vperm.xlu0 %880, %v805_v12  }
 0x3b5   :  { %v728_v14 = vpop.permute.xlu1 %727 }
 0x3b9   :  { %v718_v13 = vpop.permute.xlu0 %717 }
 0x3ba   :  { %v720_v15 = vsel %vm710_vm6, %v718_v13, 0.0 }
 0x3bb   :  { %v730_v16 = vsel %vm709_vm7, %v728_v14, %v720_v15 }
 0x3bc   :  { %731 = vst [vmem:[%s1181_s4] sm:$0xff] %v730_v16 }

</bundles_post_ra>
